<compile_context>
chip_gen: v6e
topology: v6e:2x2x1
jax: 0.10.0
libtpu: 0.0.40
codegen_flags: <defaults>
</compile_context>

<pallas_src>
import functools

import jax
import jax.numpy as jnp
from jax.experimental import pallas as pl
from jax.experimental.pallas import tpu as pltpu


def _decode_kernel(a_ref, b_ref, c_ref, x_ref, y_ref, *, na, fuse_transpose):
    """Decode one (na, no, tl) slab.

    a_ref, b_ref : (na, no, 1)  f32  per-(anchor, channel) coefficients
    c_ref        : (no, tl)     f32  per-(channel, position) additive term
    x_ref        : (na, no, tl)      raw conv activations (lane-dense in space)
    y_ref        : (na, tl, no) f32  if fuse_transpose else (na, no, tl)
    """
    s = jax.nn.sigmoid(x_ref[...].astype(jnp.float32))        # EUP (free slot)
    # Boxes / objectness / classes all collapse to one quadratic form:
    #   c<2 : (0*s + 2*stride)*s + stride*(grid-0.5)
    #   c=2,3: (4*anchor*s + 0)*s + 0
    #   c>=4: (0*s + 1)*s + 0
    y = (a_ref[...] * s + b_ref[...]) * s + c_ref[...]        # ~4 VPU ops/elem

    if not fuse_transpose:
        y_ref[...] = y.astype(y_ref.dtype)
        return

    # Fused epilogue: per-anchor 2-D transpose (XLU, overlaps with DMA/VPU) so
    # the HBM output is already in the module's (..., ny*nx, no) order; this
    # avoids a standalone XLA transpose (an extra HBM round trip of the output).
    for a in range(na):                                       # na is tiny & static
        y_ref[a] = jnp.transpose(y[a]).astype(y_ref.dtype)    # (tl, no)


def _pick_tile(L, bytes_per_lane, budget=16 << 20, cap=2048):
    """Largest multiple-of-128 divisor of L that fits the VMEM block budget."""
    if L % 128 != 0:
        # Only a full-extent last-dim block is legal for non-128-multiple L
        # (e.g. 13x13, 20x20 heads).  Fine for small L.
        # TODO(synk): pad L to a multiple of 128 wrapper-side for very large
        # non-aligned heads instead of taking one whole-L block.
        return L
    tl = 128
    c = 128
    while c <= min(L, cap):
        if L % c == 0 and c * bytes_per_lane <= budget:
            tl = c
        c += 128
    return tl


def _forward_impl(x, anchors, img_size, *, fuse_transpose):
    bs, ch, ny, nx = x.shape
    na = int(anchors.shape[0])
    assert ch % na == 0, "channels must equal num_anchors * (num_classes + 5)"
    no = ch // na
    assert no >= 5
    if isinstance(img_size, int):
        assert img_size % ny == 0, "img_size must be a multiple of the feature-map size"
    stride = img_size // ny
    L = ny * nx
    itemsize = jnp.dtype(x.dtype).itemsize

    anchors = jnp.asarray(anchors, jnp.float32)
    stride_f = jnp.float32(stride)

    # ---- tiny coefficient tables (a few KB) --------------------------------
    # A[a,c] = 4*anchor_w (c==2) / 4*anchor_h (c==3) / 0 otherwise
    A = jnp.zeros((na, no), jnp.float32)
    A = A.at[:, 2].set(4.0 * anchors[:, 0]).at[:, 3].set(4.0 * anchors[:, 1])
    A = A.reshape(na, no, 1)
    # B[a,c] = 2*stride (c<2) / 0 (c in {2,3}) / 1 (c>=4)
    B = jnp.zeros((na, no), jnp.float32)
    B = B.at[:, 0:2].set(2.0 * stride_f).at[:, 4:].set(1.0)
    B = B.reshape(na, no, 1)
    # C[c,l] = stride*(col-0.5) (c==0) / stride*(row-0.5) (c==1) / 0 otherwise
    col = jnp.tile(jnp.arange(nx, dtype=jnp.float32), ny)
    row = jnp.repeat(jnp.arange(ny, dtype=jnp.float32), nx)
    C = jnp.zeros((no, L), jnp.float32)
    C = C.at[0, :].set(stride_f * (col - 0.5)).at[1, :].set(stride_f * (row - 0.5))

    # ---- tile / VMEM sizing (per lane of the spatial tile) ------------------
    no_sub = ((no + 7) // 8) * 8            # sublane-padded channel count
    no_lane = ((no + 127) // 128) * 128     # lane-padded channel count (fused out)
    in_bpl = na * no_sub * itemsize
    c_bpl = no_sub * 4
    out_bpl = na * (no_lane if fuse_transpose else no_sub) * 4
    tmp_bpl = 3 * na * no_sub * 4           # in-kernel temporaries (rough)
    bytes_per_lane = 2 * (in_bpl + c_bpl + out_bpl) + tmp_bpl
    tl = _pick_tile(L, bytes_per_lane)
    vmem_need = tl * bytes_per_lane + (12 << 20)
    vmem_limit = int(min(max(32 << 20, vmem_need), 48 << 20))   # v7x-safe cap

    x4 = x.reshape(bs, na, no, L)           # free reshape (contiguous axes)
    grid = (L // tl, bs)                    # L-tiles outer, batch inner

    kernel = functools.partial(_decode_kernel, na=na, fuse_transpose=fuse_transpose)

    in_specs = [
        pl.BlockSpec((na, no, 1), lambda lt, b: (0, 0, 0)),          # A (resident)
        pl.BlockSpec((na, no, 1), lambda lt, b: (0, 0, 0)),          # B (resident)
        pl.BlockSpec((no, tl), lambda lt, b: (0, lt)),               # C (per L-tile)
        pl.BlockSpec((None, na, no, tl), lambda lt, b: (b, 0, 0, lt)),
    ]
    if fuse_transpose:
        out_spec = pl.BlockSpec((None, na, tl, no), lambda lt, b: (b, 0, lt, 0))
        out_shape = jax.ShapeDtypeStruct((bs, na, L, no), jnp.float32)
    else:
        out_spec = pl.BlockSpec((None, na, no, tl), lambda lt, b: (b, 0, 0, lt))
        out_shape = jax.ShapeDtypeStruct((bs, na, no, L), jnp.float32)

    y = pl.pallas_call(
        kernel,
        out_shape=out_shape,
        grid=grid,
        in_specs=in_specs,
        out_specs=out_spec,
        compiler_params=pltpu.CompilerParams(
            dimension_semantics=("parallel", "parallel"),  # independent axes; v7x megacore
            vmem_limit_bytes=vmem_limit,
        ),
        cost_estimate=pl.CostEstimate(
            flops=6 * bs * na * no * L,
            transcendentals=bs * na * no * L,               # one sigmoid per element
            bytes_accessed=(bs * na * no * L) * (itemsize + 4) + int(C.size) * 4,
        ),
    )(A, B, C, x4)

    if fuse_transpose:
        return y.reshape(bs, na * L, no)                    # pure metadata reshape
    # Fallback: lane-dense kernel output + standalone XLA transpose (one extra
    # HBM round trip of the output) -- only used if the fused epilogue does not
    # lower on this Mosaic build.
    return jnp.transpose(y, (0, 1, 3, 2)).reshape(bs, na * L, no)


def yolo_layer_forward(x, anchors, img_size):
    """Eval-mode YOLOLayer.forward.

    x       : (bs, na*no, ny, nx)  NCHW conv output (f32 or bf16)
    anchors : (na, 2) float32 (raw pixel units, as in the module buffer)
    returns : (bs, na*ny*nx, no) float32 decoded predictions
    """
    # TODO(synk): the training/validation branch (returns the permuted raw x)
    # and the unused loss members are not implemented; only eval decode is.
    try:
        out = _forward_impl(x, anchors, img_size, fuse_transpose=True)
        return jax.block_until_ready(out)        # surface lowering errors here
    except Exception:
        out = _forward_impl(x, anchors, img_size, fuse_transpose=False)
        return jax.block_until_ready(out)


def yolo_layer_reference(x, anchors, img_size):
    """Pure-JAX reference mirroring the PyTorch eval-mode forward."""
    bs, ch, ny, nx = x.shape
    na = anchors.shape[0]
    no = ch // na
    stride = img_size // ny
    xr = x.reshape(bs, na, no, ny, nx).transpose(0, 1, 3, 4, 2)
    y = jax.nn.sigmoid(xr)
    yv, xv = jnp.meshgrid(jnp.arange(ny), jnp.arange(nx), indexing="ij")
    grid = jnp.stack((xv, yv), 2).reshape(1, 1, ny, nx, 2).astype(jnp.float32)
    xy = (y[..., 0:2] * 2.0 - 0.5 + grid) * stride
    wh = (y[..., 2:4] * 2.0) ** 2 * anchors.reshape(1, na, 1, 1, 2)
    rest = y[..., 4:]
    out = jnp.concatenate([xy, wh, rest], axis=-1)
    return out.reshape(bs, -1, no)


if __name__ == "__main__":
    # Deterministic "parameters": YOLO-style anchors (module buffers).
    anchor_pairs = [(10.0, 13.0), (16.0, 30.0), (33.0, 23.0)]
    anchors = jnp.asarray(anchor_pairs, dtype=jnp.float32)        # (na=3, 2)

    num_classes = 2
    na = anchors.shape[0]
    no = num_classes + 5                                           # 7
    bs, ny, nx = 2, 16, 16
    img_size = 64                                                  # stride = 4

    key = jax.random.PRNGKey(0)
    x = jax.random.normal(key, (bs, na * no, ny, nx), dtype=jnp.float32)

    out = yolo_layer_forward(x, anchors, img_size)
    out = jax.block_until_ready(out)

    ref = yolo_layer_reference(x, anchors, img_size)
    assert out.shape == (bs, na * ny * nx, no), out.shape
    assert bool(jnp.allclose(out, ref, atol=1e-4, rtol=1e-5)), "mismatch vs reference"

    print("KERNEL_OK")
</pallas_src>

<mosaic_0001>
module attributes {stable_mosaic.version = 11 : i64} {
  func.func @_decode_kernel(%arg0: i32, %arg1: i32, %arg2: memref<3x7x1xf32, #tpu.memory_space<vmem>>, %arg3: memref<3x7x1xf32, #tpu.memory_space<vmem>>, %arg4: memref<7x256xf32, #tpu.memory_space<vmem>>, %arg5: memref<1x3x7x256xf32, #tpu.memory_space<vmem>>, %arg6: memref<1x3x256x7xf32, #tpu.memory_space<vmem>>) attributes {dimension_semantics = [#tpu.dimension_semantics<parallel>, #tpu.dimension_semantics<parallel>], iteration_bounds = array<i64: 1, 2>, scalar_prefetch = 0 : i64, scratch_operands = 0 : i64, tpu.core_type = #tpu.core_type<tc>, window_params = [{pipeline_mode = #tpu.pipeline_mode<synchronous>, transform_indices = @transform_0, window_bounds = array<i64: 3, 7, 1>}, {pipeline_mode = #tpu.pipeline_mode<synchronous>, transform_indices = @transform_1, window_bounds = array<i64: 3, 7, 1>}, {transform_indices = @transform_2, window_bounds = array<i64: 7, 256>}, {transform_indices = @transform_3, window_bounds = array<i64: 1, 3, 7, 256>}, {transform_indices = @transform_4, window_bounds = array<i64: 1, 3, 256, 7>}]} {
    %c0 = arith.constant 0 : index
    %c0_0 = arith.constant 0 : index
    %c0_1 = arith.constant 0 : index
    %c0_2 = arith.constant 0 : index
    %0 = vector.load %arg5[%c0, %c0_0, %c0_1, %c0_2] : memref<1x3x7x256xf32, #tpu.memory_space<vmem>>, vector<1x3x7x256xf32>
    %1 = vector.shape_cast %0 : vector<1x3x7x256xf32> to vector<3x7x256xf32>
    %2 = arith.negf %1 : vector<3x7x256xf32>
    %3 = math.exp %2 : vector<3x7x256xf32>
    %cst = arith.constant 1.000000e+00 : f32
    %4 = vector.broadcast %cst : f32 to vector<3x7x256xf32>
    %5 = arith.addf %4, %3 : vector<3x7x256xf32>
    %6 = arith.divf %4, %5 : vector<3x7x256xf32>
    %c0_3 = arith.constant 0 : index
    %c0_4 = arith.constant 0 : index
    %c0_5 = arith.constant 0 : index
    %7 = vector.load %arg2[%c0_3, %c0_4, %c0_5] : memref<3x7x1xf32, #tpu.memory_space<vmem>>, vector<3x7x1xf32>
    %8 = vector.broadcast %7 : vector<3x7x1xf32> to vector<3x7x256xf32>
    %9 = arith.mulf %8, %6 : vector<3x7x256xf32>
    %c0_6 = arith.constant 0 : index
    %c0_7 = arith.constant 0 : index
    %c0_8 = arith.constant 0 : index
    %10 = vector.load %arg3[%c0_6, %c0_7, %c0_8] : memref<3x7x1xf32, #tpu.memory_space<vmem>>, vector<3x7x1xf32>
    %11 = vector.broadcast %10 : vector<3x7x1xf32> to vector<3x7x256xf32>
    %12 = arith.addf %9, %11 : vector<3x7x256xf32>
    %13 = arith.mulf %12, %6 : vector<3x7x256xf32>
    %c0_9 = arith.constant 0 : index
    %c0_10 = arith.constant 0 : index
    %14 = vector.load %arg4[%c0_9, %c0_10] : memref<7x256xf32, #tpu.memory_space<vmem>>, vector<7x256xf32>
    %15 = vector.shape_cast %14 : vector<7x256xf32> to vector<1x7x256xf32>
    %16 = vector.broadcast %15 : vector<1x7x256xf32> to vector<3x7x256xf32>
    %17 = arith.addf %13, %16 : vector<3x7x256xf32>
    %18 = vector.extract_strided_slice %17 {offsets = [0, 0, 0], sizes = [1, 7, 256], strides = [1, 1, 1]} : vector<3x7x256xf32> to vector<1x7x256xf32>
    %19 = vector.shape_cast %18 : vector<1x7x256xf32> to vector<7x256xf32>
    %20 = tpu.transpose %19, [1, 0] : vector<7x256xf32> -> vector<256x7xf32>
    %c0_11 = arith.constant 0 : index
    %c0_12 = arith.constant 0 : index
    %c0_13 = arith.constant 0 : index
    %c0_14 = arith.constant 0 : index
    %21 = vector.load %arg6[%c0_11, %c0_12, %c0_13, %c0_14] : memref<1x3x256x7xf32, #tpu.memory_space<vmem>>, vector<1x1x256x7xf32>
    %22 = vector.shape_cast %21 : vector<1x1x256x7xf32> to vector<256x7xf32>
    %23 = vector.shape_cast %20 : vector<256x7xf32> to vector<1x1x256x7xf32>
    tpu.vector_store %arg6[%c0_11, %c0_12, %c0_13, %c0_14], %23 {strides = array<i32>} : memref<1x3x256x7xf32, #tpu.memory_space<vmem>>, vector<1x1x256x7xf32>,
    %24 = vector.extract_strided_slice %17 {offsets = [1, 0, 0], sizes = [1, 7, 256], strides = [1, 1, 1]} : vector<3x7x256xf32> to vector<1x7x256xf32>
    %25 = vector.shape_cast %24 : vector<1x7x256xf32> to vector<7x256xf32>
    %26 = tpu.transpose %25, [1, 0] : vector<7x256xf32> -> vector<256x7xf32>
    %c0_15 = arith.constant 0 : index
    %c1 = arith.constant 1 : index
    %c0_16 = arith.constant 0 : index
    %c0_17 = arith.constant 0 : index
    %27 = vector.load %arg6[%c0_15, %c1, %c0_16, %c0_17] : memref<1x3x256x7xf32, #tpu.memory_space<vmem>>, vector<1x1x256x7xf32>
    %28 = vector.shape_cast %27 : vector<1x1x256x7xf32> to vector<256x7xf32>
    %29 = vector.shape_cast %26 : vector<256x7xf32> to vector<1x1x256x7xf32>
    tpu.vector_store %arg6[%c0_15, %c1, %c0_16, %c0_17], %29 {strides = array<i32>} : memref<1x3x256x7xf32, #tpu.memory_space<vmem>>, vector<1x1x256x7xf32>,
    %30 = vector.extract_strided_slice %17 {offsets = [2, 0, 0], sizes = [1, 7, 256], strides = [1, 1, 1]} : vector<3x7x256xf32> to vector<1x7x256xf32>
    %31 = vector.shape_cast %30 : vector<1x7x256xf32> to vector<7x256xf32>
    %32 = tpu.transpose %31, [1, 0] : vector<7x256xf32> -> vector<256x7xf32>
    %c0_18 = arith.constant 0 : index
    %c2 = arith.constant 2 : index
    %c0_19 = arith.constant 0 : index
    %c0_20 = arith.constant 0 : index
    %33 = vector.load %arg6[%c0_18, %c2, %c0_19, %c0_20] : memref<1x3x256x7xf32, #tpu.memory_space<vmem>>, vector<1x1x256x7xf32>
    %34 = vector.shape_cast %33 : vector<1x1x256x7xf32> to vector<256x7xf32>
    %35 = vector.shape_cast %32 : vector<256x7xf32> to vector<1x1x256x7xf32>
    tpu.vector_store %arg6[%c0_18, %c2, %c0_19, %c0_20], %35 {strides = array<i32>} : memref<1x3x256x7xf32, #tpu.memory_space<vmem>>, vector<1x1x256x7xf32>,
    return
  }
  func.func @transform_0(%arg0: i32, %arg1: i32) -> (i32, i32, i32) {
    %c0_i32 = arith.constant 0 : i32
    %c0_i32_0 = arith.constant 0 : i32
    %c0_i32_1 = arith.constant 0 : i32
    %c0_i32_2 = arith.constant 0 : i32
    return %c0_i32, %c0_i32_0, %c0_i32_1 : i32, i32, i32
  }
  func.func @transform_1(%arg0: i32, %arg1: i32) -> (i32, i32, i32) {
    %c0_i32 = arith.constant 0 : i32
    %c0_i32_0 = arith.constant 0 : i32
    %c0_i32_1 = arith.constant 0 : i32
    %c0_i32_2 = arith.constant 0 : i32
    return %c0_i32, %c0_i32_0, %c0_i32_1 : i32, i32, i32
  }
  func.func @transform_2(%arg0: i32, %arg1: i32) -> (i32, i32) {
    %c0_i32 = arith.constant 0 : i32
    %c0_i32_0 = arith.constant 0 : i32
    return %c0_i32, %arg0 : i32, i32
  }
  func.func @transform_3(%arg0: i32, %arg1: i32) -> (i32, i32, i32, i32) {
    %c0_i32 = arith.constant 0 : i32
    %c0_i32_0 = arith.constant 0 : i32
    %c0_i32_1 = arith.constant 0 : i32
    return %arg1, %c0_i32, %c0_i32_0, %arg0 : i32, i32, i32, i32
  }
  func.func @transform_4(%arg0: i32, %arg1: i32) -> (i32, i32, i32, i32) {
    %c0_i32 = arith.constant 0 : i32
    %c0_i32_0 = arith.constant 0 : i32
    %c0_i32_1 = arith.constant 0 : i32
    return %arg1, %c0_i32, %arg0, %c0_i32_0 : i32, i32, i32, i32
  }
}

module attributes {stable_mosaic.version = 11 : i64} {
  func.func @_decode_kernel(%arg0: i32, %arg1: i32, %arg2: memref<3x7x1xf32, #tpu.memory_space<vmem>>, %arg3: memref<3x7x1xf32, #tpu.memory_space<vmem>>, %arg4: memref<7x256xf32, #tpu.memory_space<vmem>>, %arg5: memref<1x3x7x256xf32, #tpu.memory_space<vmem>>, %arg6: memref<1x3x7x256xf32, #tpu.memory_space<vmem>>) attributes {dimension_semantics = [#tpu.dimension_semantics<parallel>, #tpu.dimension_semantics<parallel>], iteration_bounds = array<i64: 1, 2>, scalar_prefetch = 0 : i64, scratch_operands = 0 : i64, tpu.core_type = #tpu.core_type<tc>, window_params = [{pipeline_mode = #tpu.pipeline_mode<synchronous>, transform_indices = @transform_0, window_bounds = array<i64: 3, 7, 1>}, {pipeline_mode = #tpu.pipeline_mode<synchronous>, transform_indices = @transform_1, window_bounds = array<i64: 3, 7, 1>}, {transform_indices = @transform_2, window_bounds = array<i64: 7, 256>}, {transform_indices = @transform_3, window_bounds = array<i64: 1, 3, 7, 256>}, {transform_indices = @transform_4, window_bounds = array<i64: 1, 3, 7, 256>}]} {
    %c0 = arith.constant 0 : index
    %c0_0 = arith.constant 0 : index
    %c0_1 = arith.constant 0 : index
    %c0_2 = arith.constant 0 : index
    %0 = vector.load %arg5[%c0, %c0_0, %c0_1, %c0_2] : memref<1x3x7x256xf32, #tpu.memory_space<vmem>>, vector<1x3x7x256xf32>
    %1 = vector.shape_cast %0 : vector<1x3x7x256xf32> to vector<3x7x256xf32>
    %2 = arith.negf %1 : vector<3x7x256xf32>
    %3 = math.exp %2 : vector<3x7x256xf32>
    %cst = arith.constant 1.000000e+00 : f32
    %4 = vector.broadcast %cst : f32 to vector<3x7x256xf32>
    %5 = arith.addf %4, %3 : vector<3x7x256xf32>
    %6 = arith.divf %4, %5 : vector<3x7x256xf32>
    %c0_3 = arith.constant 0 : index
    %c0_4 = arith.constant 0 : index
    %c0_5 = arith.constant 0 : index
    %7 = vector.load %arg2[%c0_3, %c0_4, %c0_5] : memref<3x7x1xf32, #tpu.memory_space<vmem>>, vector<3x7x1xf32>
    %8 = vector.broadcast %7 : vector<3x7x1xf32> to vector<3x7x256xf32>
    %9 = arith.mulf %8, %6 : vector<3x7x256xf32>
    %c0_6 = arith.constant 0 : index
    %c0_7 = arith.constant 0 : index
    %c0_8 = arith.constant 0 : index
    %10 = vector.load %arg3[%c0_6, %c0_7, %c0_8] : memref<3x7x1xf32, #tpu.memory_space<vmem>>, vector<3x7x1xf32>
    %11 = vector.broadcast %10 : vector<3x7x1xf32> to vector<3x7x256xf32>
    %12 = arith.addf %9, %11 : vector<3x7x256xf32>
    %13 = arith.mulf %12, %6 : vector<3x7x256xf32>
    %c0_9 = arith.constant 0 : index
    %c0_10 = arith.constant 0 : index
    %14 = vector.load %arg4[%c0_9, %c0_10] : memref<7x256xf32, #tpu.memory_space<vmem>>, vector<7x256xf32>
    %15 = vector.shape_cast %14 : vector<7x256xf32> to vector<1x7x256xf32>
    %16 = vector.broadcast %15 : vector<1x7x256xf32> to vector<3x7x256xf32>
    %17 = arith.addf %13, %16 : vector<3x7x256xf32>
    %c0_11 = arith.constant 0 : index
    %c0_12 = arith.constant 0 : index
    %c0_13 = arith.constant 0 : index
    %c0_14 = arith.constant 0 : index
    %18 = vector.load %arg6[%c0_11, %c0_12, %c0_13, %c0_14] : memref<1x3x7x256xf32, #tpu.memory_space<vmem>>, vector<1x3x7x256xf32>
    %19 = vector.shape_cast %18 : vector<1x3x7x256xf32> to vector<3x7x256xf32>
    %20 = vector.shape_cast %17 : vector<3x7x256xf32> to vector<1x3x7x256xf32>
    tpu.vector_store %arg6[%c0_11, %c0_12, %c0_13, %c0_14], %20 {strides = array<i32>} : memref<1x3x7x256xf32, #tpu.memory_space<vmem>>, vector<1x3x7x256xf32>,
    return
  }
  func.func @transform_0(%arg0: i32, %arg1: i32) -> (i32, i32, i32) {
    %c0_i32 = arith.constant 0 : i32
    %c0_i32_0 = arith.constant 0 : i32
    %c0_i32_1 = arith.constant 0 : i32
    %c0_i32_2 = arith.constant 0 : i32
    return %c0_i32, %c0_i32_0, %c0_i32_1 : i32, i32, i32
  }
  func.func @transform_1(%arg0: i32, %arg1: i32) -> (i32, i32, i32) {
    %c0_i32 = arith.constant 0 : i32
    %c0_i32_0 = arith.constant 0 : i32
    %c0_i32_1 = arith.constant 0 : i32
    %c0_i32_2 = arith.constant 0 : i32
    return %c0_i32, %c0_i32_0, %c0_i32_1 : i32, i32, i32
  }
  func.func @transform_2(%arg0: i32, %arg1: i32) -> (i32, i32) {
    %c0_i32 = arith.constant 0 : i32
    %c0_i32_0 = arith.constant 0 : i32
    return %c0_i32, %arg0 : i32, i32
  }
  func.func @transform_3(%arg0: i32, %arg1: i32) -> (i32, i32, i32, i32) {
    %c0_i32 = arith.constant 0 : i32
    %c0_i32_0 = arith.constant 0 : i32
    %c0_i32_1 = arith.constant 0 : i32
    return %arg1, %c0_i32, %c0_i32_0, %arg0 : i32, i32, i32, i32
  }
  func.func @transform_4(%arg0: i32, %arg1: i32) -> (i32, i32, i32, i32) {
    %c0_i32 = arith.constant 0 : i32
    %c0_i32_0 = arith.constant 0 : i32
    %c0_i32_1 = arith.constant 0 : i32
    return %arg1, %c0_i32, %c0_i32_0, %arg0 : i32, i32, i32, i32
  }
}

</mosaic_0001>

<bundles_post_ra>
// kernel: tpu_custom_call.1
= control target key start
LH: loop header
LB: loop body
LE: loop exit
PB: predicated region body
PF: predicated region fallthrough
CT: control target
= control target key end

     0   :  { %s940_s15 = smov 0   ;;  %s942_s16 = smov 0   ;;  %s1203_s0 = inlined_call_operand.vmem [shape: f32[3,7,1], index: 0, kind: input, shape index: {}]   ;;  %s1204_s1 = inlined_call_operand.vmem [shape: f32[3,7,1], index: 1, kind: input, shape index: {}]   ;;  %s1205_s2 = inlined_call_operand.vmem [shape: f32[7,256], index: 2, kind: input, shape index: {}]   ;;  %s1206_s3 = inlined_call_operand.vmem [shape: f32[2,3,7,256], index: 3, kind: input, shape index: {}]   ;;  %s1207_s4 = inlined_call_operand.vmem [shape: f32[2,3,256,7], index: 4, kind: output, shape index: {}]  }
   0x1   :  { %s944_s17 = smov 0  }
   0x2 LB: > { %s23_s18 = sadd.s32 1, %s908_s16  ;;  %p761_p0 = scmp.ge.s32.totalorder %s912_s17, 1  ;;  %s912_s17 = sphi %s944_s17, %s14_s17   ;;  %s908_s16 = sphi %s942_s16, %s1209_s16   ;;  %s904_s15 = sphi %s940_s15, %s1208_s15  }
   0x3   : > { %p24_p1 = scmp.ge.s32.totalorder %s23_s18, 2  ;;  %p194_p2 = scmp.lt.s32.totalorder %s912_s17, 3 }
   0x5   : > { %s1211_s18 = smov (%p24_p1, %s23_s18), 0  ;;  %p195_p3 = pnand %p761_p0, %p194_p2 }
   0x6   : > { %p240_p4 = scmp.lt.s32.totalorder (!%p195_p3), %s904_s15, 1 }
   0x7   : > { %198 = sbr.rel (%p195_p3) target bundleno = 462 (0x1ce), region = 36 }
   0xc   : > { %v303_v0 = vld [vmem:[%s1203_s0 + $0x10] sm:$0x7f]  ;;  %v301_v1 = vld [vmem:[%s1203_s0] sm:$0x7f]  ;;  %v914_v2 = vmov 0   ;;  %s1213_s15 = smov (!%p240_p4, %s904_s15), 1 }
   0xd   : > { %865 = vset.pattern.permute.xlu1 %v914_v2  ;;  %864 = vset.pattern.permute.xlu0 %v914_v2  ;;  %v325_v3 = vld [vmem:[%s1204_s1] sm:$0x7f]  ;;  %v302_v4 = vld [vmem:[%s1203_s0 + $0x8] sm:$0x7f]  ;;  %v327_v5 = vld [vmem:[%s1204_s1 + $0x10] sm:$0x7f] }
   0xe   : > { %316 = vperm.xlu1 %865, %v303_v0   ;;  %306 = vperm.xlu0 %864, %v301_v1   ;;  %v326_v6 = vld [vmem:[%s1204_s1 + $0x8] sm:$0x7f]  ;;  %s836_s5 = smul.u32 48, %s1213_s15  ;;  %v355_v38 = vld [vmem:[%s1205_s2] sm:$0x7f]  ;;  %vm427_vm0 = vcmask 56320  }
   0xf   : > { %v356_v39 = vld [vmem:[%s1205_s2 + $0x8] sm:$0x7f]  ;;  %s837_s13 = smul.u32 768, %s1213_s15 }
  0x10   : > { %s982_s8 = scalar_lea.vmem %s1206_s3, %s836_s5 }
  0x11   : > { %v263_v7 = vld [vmem:[%s982_s8 + $0x20] sm:$0x7f]  ;;  %v264_v8 = vld [vmem:[%s982_s8 + $0x28] sm:$0x7f]  ;;  %v261_v49 = vld [vmem:[%s982_s8 + $0x10] sm:$0x7f]  ;;  %s1000_s20 = scalar_lea.vmem %s1207_s4, %s837_s13 }
  0x12   : > { %330 = vperm.xlu1 %865, %v325_v3   ;;  %311 = vperm.xlu0 %864, %v302_v4   ;;  %v259_v9 = vld [vmem:[%s982_s8] sm:$0x7f]  ;;  %v768_v10 = vmul.f32 -1.442695, %v263_v7  ;;  %v260_v11 = vld [vmem:[%s982_s8 + $0x8] sm:$0x7f] }
  0x13   : > { %v769_v12 = vmul.f32 -1.442695, %v264_v8  ;;  %v764_v13 = vmul.f32 -1.442695, %v259_v9  ;;  %v765_v14 = vmul.f32 -1.442695, %v260_v11 }
  0x14   : > { %866 = vpow2.f32 %v768_v10  ;;  %v262_v50 = vld [vmem:[%s982_s8 + $0x18] sm:$0x7f]  ;;  %v766_v51 = vmul.f32 -1.442695, %v261_v49 }
  0x15   : > { %868 = vpow2.f32 %v769_v12  ;;  %v767_v52 = vmul.f32 -1.442695, %v262_v50 }
  0x16   : > { %340 = vperm.xlu1 %865, %v327_v5   ;;  %335 = vperm.xlu0 %864, %v326_v6   ;;  %870 = vpow2.f32 %v764_v13 }
  0x17   : > { %872 = vpow2.f32 %v765_v14 }
  0x21   : > { %v867_v15 = vpop.eup %866 }
  0x22   : > { %v869_v16 = vpop.eup %868  ;;  %v287_v19 = vadd.f32 1.0, %v867_v15 }
  0x23   : > { %v871_v17 = vpop.eup %870  ;;  %v288_v20 = vadd.f32 1.0, %v869_v16 }
  0x24   : > { %v873_v18 = vpop.eup %872  ;;  %v283_v21 = vadd.f32 1.0, %v871_v17  ;;  %874 = vrcp.f32 %v287_v19 }
  0x25   : > { %v284_v22 = vadd.f32 1.0, %v873_v18  ;;  %876 = vrcp.f32 %v288_v20 }
  0x26   : > { %878 = vrcp.f32 %v283_v21 }
  0x27   : > { %880 = vrcp.f32 %v284_v22 }
  0x28   : > { %882 = vpow2.f32 %v766_v51 }
  0x29   : > { %884 = vpow2.f32 %v767_v52 }
  0x31   : > { %v875_v23 = vpop.eup %874 }
  0x32   : > { %v877_v24 = vpop.eup %876 }
  0x33   : > { %v879_v25 = vpop.eup %878 }
  0x34   : > { %v881_v26 = vpop.eup %880 }
  0x35   : > { %v883_v53 = vpop.eup %882 }
  0x36   : > { %v885_v54 = vpop.eup %884  ;;  %v285_v55 = vadd.f32 1.0, %v883_v53 }
  0x37   : > { %v286_v56 = vadd.f32 1.0, %v885_v54 }
  0x38   : > { %886 = vrcp.f32 %v285_v55 }
  0x39   : > { %888 = vrcp.f32 %v286_v56 }
  0x45   : > { %v887_v58 = vpop.eup %886 }
  0x46   : > { %v889_v59 = vpop.eup %888 }
  0x89   : > { %v317_v27 = vpop.permute.xlu1 %316  ;;  %v307_v28 = vpop.permute.xlu0 %306 }
  0x8a   : > { %v323_v29 = vmul.f32 %v875_v23, %v317_v27  ;;  %v324_v30 = vmul.f32 %v877_v24, %v317_v27  ;;  %v319_v31 = vmul.f32 %v879_v25, %v307_v28  ;;  %v320_v32 = vmul.f32 %v881_v26, %v307_v28 }
  0x8d   : > { %v331_v33 = vpop.permute.xlu1 %330  ;;  %v312_v57 = vpop.permute.xlu0 %311 }
  0x8e   : > { %v343_v34 = vadd.f32 %v331_v33, %v319_v31  ;;  %v344_v35 = vadd.f32 %v331_v33, %v320_v32  ;;  %v321_v61 = vmul.f32 %v887_v58, %v312_v57  ;;  %v322_v62 = vmul.f32 %v889_v59, %v312_v57 }
  0x90   : > { %v349_v36 = vmul.f32 %v879_v25, %v343_v34  ;;  %v350_v37 = vmul.f32 %v881_v26, %v344_v35 }
  0x91   : > { %v341_v40 = vpop.permute.xlu1 %340  ;;  %v336_v60 = vpop.permute.xlu0 %335 }
  0x92   : > { %v347_v41 = vadd.f32 %v341_v40, %v323_v29  ;;  %v348_v42 = vadd.f32 %v341_v40, %v324_v30  ;;  %v358_v43 = vadd.f32 %v356_v39, %v350_v37  ;;  %v357_v44 = vadd.f32 %v355_v38, %v349_v36 }
  0x93   : > { %v345_v63 = vadd.f32 %v336_v60, %v321_v61  ;;  %v346_v0 = vadd.f32 %v336_v60, %v322_v62 }
  0x94   : > { %v353_v45 = vmul.f32 %v875_v23, %v347_v41  ;;  %v354_v46 = vmul.f32 %v877_v24, %v348_v42  ;;  %395 = vxpose.xlu1.b32.start.end [1/1] (short) %v358_v43, 128  ;;  %363 = vxpose.xlu0.b32.start.end [1/1] (short) %v357_v44, 128 }
  0x95   : > { %v351_v1 = vmul.f32 %v887_v58, %v345_v63  ;;  %v352_v2 = vmul.f32 %v889_v59, %v346_v0 }
  0x96   : > { %v361_v47 = vadd.f32 %v355_v38, %v353_v45  ;;  %v362_v48 = vadd.f32 %v356_v39, %v354_v46 }
  0x97   : > { %v360_v3 = vadd.f32 %v356_v39, %v352_v2  ;;  %v359_v4 = vadd.f32 %v355_v38, %v351_v1 }
  0xd1   : > { %492 = vxpose.xlu1.b32.start.end [1/1] (short) %v360_v3, 128  ;;  %460 = vxpose.xlu0.b32.start.end [1/1] (short) %v359_v4, 128 }
 0x10e   : > { %589 = vxpose.xlu1.b32.start.end [1/1] (short) %v362_v48, 128  ;;  %557 = vxpose.xlu0.b32.start.end [1/1] (short) %v361_v47, 128 }
 0x110   : > { %v411_v5 = vpop.trf.xlu1  ;;  %v379_v6 = vpop.trf.xlu0 }
 0x111   : > { %444 = vst.msk [vmem:[%s1000_s20 + $0x80] sm:$0xff] %vm427_vm0, %v411_v5  ;;  %428 = vst.msk [vmem:[%s1000_s20] sm:$0xff] %vm427_vm0, %v379_v6 }
 0x114   : > { %v412_v7 = vpop.trf.xlu1  ;;  %v380_v8 = vpop.trf.xlu0 }
 0x115   : > { %445 = vst.msk [vmem:[%s1000_s20 + $0x88] sm:$0xff] %vm427_vm0, %v412_v7  ;;  %429 = vst.msk [vmem:[%s1000_s20 + $0x8] sm:$0xff] %vm427_vm0, %v380_v8 }
 0x118   : > { %v413_v9 = vpop.trf.xlu1  ;;  %v381_v10 = vpop.trf.xlu0 }
 0x119   : > { %446 = vst.msk [vmem:[%s1000_s20 + $0x90] sm:$0xff] %vm427_vm0, %v413_v9  ;;  %430 = vst.msk [vmem:[%s1000_s20 + $0x10] sm:$0xff] %vm427_vm0, %v381_v10 }
 0x11c   : > { %v414_v11 = vpop.trf.xlu1  ;;  %v382_v12 = vpop.trf.xlu0 }
 0x11d   : > { %447 = vst.msk [vmem:[%s1000_s20 + $0x98] sm:$0xff] %vm427_vm0, %v414_v11  ;;  %431 = vst.msk [vmem:[%s1000_s20 + $0x18] sm:$0xff] %vm427_vm0, %v382_v12 }
 0x120   : > { %v415_v13 = vpop.trf.xlu1  ;;  %v383_v14 = vpop.trf.xlu0 }
 0x121   : > { %448 = vst.msk [vmem:[%s1000_s20 + $0xa0] sm:$0xff] %vm427_vm0, %v415_v13  ;;  %432 = vst.msk [vmem:[%s1000_s20 + $0x20] sm:$0xff] %vm427_vm0, %v383_v14 }
 0x124   : > { %v416_v15 = vpop.trf.xlu1  ;;  %v384_v16 = vpop.trf.xlu0 }
 0x125   : > { %449 = vst.msk [vmem:[%s1000_s20 + $0xa8] sm:$0xff] %vm427_vm0, %v416_v15  ;;  %433 = vst.msk [vmem:[%s1000_s20 + $0x28] sm:$0xff] %vm427_vm0, %v384_v16 }
 0x128   : > { %v417_v17 = vpop.trf.xlu1  ;;  %v385_v18 = vpop.trf.xlu0 }
 0x129   : > { %450 = vst.msk [vmem:[%s1000_s20 + $0xb0] sm:$0xff] %vm427_vm0, %v417_v17  ;;  %434 = vst.msk [vmem:[%s1000_s20 + $0x30] sm:$0xff] %vm427_vm0, %v385_v18 }
 0x12c   : > { %v418_v19 = vpop.trf.xlu1  ;;  %v386_v20 = vpop.trf.xlu0 }
 0x12d   : > { %451 = vst.msk [vmem:[%s1000_s20 + $0xb8] sm:$0xff] %vm427_vm0, %v418_v19  ;;  %435 = vst.msk [vmem:[%s1000_s20 + $0x38] sm:$0xff] %vm427_vm0, %v386_v20 }
 0x130   : > { %v419_v21 = vpop.trf.xlu1  ;;  %v387_v22 = vpop.trf.xlu0 }
 0x131   : > { %452 = vst.msk [vmem:[%s1000_s20 + $0xc0] sm:$0xff] %vm427_vm0, %v419_v21  ;;  %436 = vst.msk [vmem:[%s1000_s20 + $0x40] sm:$0xff] %vm427_vm0, %v387_v22 }
 0x134   : > { %v420_v23 = vpop.trf.xlu1  ;;  %v388_v24 = vpop.trf.xlu0 }
 0x135   : > { %453 = vst.msk [vmem:[%s1000_s20 + $0xc8] sm:$0xff] %vm427_vm0, %v420_v23  ;;  %437 = vst.msk [vmem:[%s1000_s20 + $0x48] sm:$0xff] %vm427_vm0, %v388_v24 }
 0x138   : > { %v421_v25 = vpop.trf.xlu1  ;;  %v389_v26 = vpop.trf.xlu0 }
 0x139   : > { %454 = vst.msk [vmem:[%s1000_s20 + $0xd0] sm:$0xff] %vm427_vm0, %v421_v25  ;;  %438 = vst.msk [vmem:[%s1000_s20 + $0x50] sm:$0xff] %vm427_vm0, %v389_v26 }
 0x13c   : > { %v422_v27 = vpop.trf.xlu1  ;;  %v390_v28 = vpop.trf.xlu0 }
 0x13d   : > { %455 = vst.msk [vmem:[%s1000_s20 + $0xd8] sm:$0xff] %vm427_vm0, %v422_v27  ;;  %439 = vst.msk [vmem:[%s1000_s20 + $0x58] sm:$0xff] %vm427_vm0, %v390_v28 }
 0x140   : > { %v423_v29 = vpop.trf.xlu1  ;;  %v391_v30 = vpop.trf.xlu0 }
 0x141   : > { %456 = vst.msk [vmem:[%s1000_s20 + $0xe0] sm:$0xff] %vm427_vm0, %v423_v29  ;;  %440 = vst.msk [vmem:[%s1000_s20 + $0x60] sm:$0xff] %vm427_vm0, %v391_v30 }
 0x144   : > { %v424_v31 = vpop.trf.xlu1  ;;  %v392_v32 = vpop.trf.xlu0 }
 0x145   : > { %457 = vst.msk [vmem:[%s1000_s20 + $0xe8] sm:$0xff] %vm427_vm0, %v424_v31  ;;  %441 = vst.msk [vmem:[%s1000_s20 + $0x68] sm:$0xff] %vm427_vm0, %v392_v32 }
 0x148   : > { %v425_v33 = vpop.trf.xlu1  ;;  %v393_v34 = vpop.trf.xlu0 }
 0x149   : > { %458 = vst.msk [vmem:[%s1000_s20 + $0xf0] sm:$0xff] %vm427_vm0, %v425_v33  ;;  %442 = vst.msk [vmem:[%s1000_s20 + $0x70] sm:$0xff] %vm427_vm0, %v393_v34 }
 0x14c   : > { %v426_v35 = vpop.trf.xlu1  ;;  %v394_v36 = vpop.trf.xlu0 }
 0x14d   : > { %459 = vst.msk [vmem:[%s1000_s20 + $0xf8] sm:$0xff] %vm427_vm0, %v426_v35  ;;  %443 = vst.msk [vmem:[%s1000_s20 + $0x78] sm:$0xff] %vm427_vm0, %v394_v36 }
 0x150   : > { %v508_v37 = vpop.trf.xlu1  ;;  %v476_v38 = vpop.trf.xlu0 }
 0x151   : > { %786 = vst.msk [vmem:[%s1000_s20 + $0x180] sm:$0xff] %vm427_vm0, %v508_v37  ;;  %770 = vst.msk [vmem:[%s1000_s20 + $0x100] sm:$0xff] %vm427_vm0, %v476_v38 }
 0x154   : > { %v509_v39 = vpop.trf.xlu1  ;;  %v477_v40 = vpop.trf.xlu0 }
 0x155   : > { %787 = vst.msk [vmem:[%s1000_s20 + $0x188] sm:$0xff] %vm427_vm0, %v509_v39  ;;  %771 = vst.msk [vmem:[%s1000_s20 + $0x108] sm:$0xff] %vm427_vm0, %v477_v40 }
 0x158   : > { %v510_v41 = vpop.trf.xlu1  ;;  %v478_v42 = vpop.trf.xlu0 }
 0x159   : > { %788 = vst.msk [vmem:[%s1000_s20 + $0x190] sm:$0xff] %vm427_vm0, %v510_v41  ;;  %772 = vst.msk [vmem:[%s1000_s20 + $0x110] sm:$0xff] %vm427_vm0, %v478_v42 }
 0x15c   : > { %v511_v43 = vpop.trf.xlu1  ;;  %v479_v44 = vpop.trf.xlu0 }
 0x15d   : > { %789 = vst.msk [vmem:[%s1000_s20 + $0x198] sm:$0xff] %vm427_vm0, %v511_v43  ;;  %773 = vst.msk [vmem:[%s1000_s20 + $0x118] sm:$0xff] %vm427_vm0, %v479_v44 }
 0x160   : > { %v512_v45 = vpop.trf.xlu1  ;;  %v480_v46 = vpop.trf.xlu0 }
 0x161   : > { %790 = vst.msk [vmem:[%s1000_s20 + $0x1a0] sm:$0xff] %vm427_vm0, %v512_v45  ;;  %774 = vst.msk [vmem:[%s1000_s20 + $0x120] sm:$0xff] %vm427_vm0, %v480_v46 }
 0x164   : > { %v513_v47 = vpop.trf.xlu1  ;;  %v481_v48 = vpop.trf.xlu0 }
 0x165   : > { %791 = vst.msk [vmem:[%s1000_s20 + $0x1a8] sm:$0xff] %vm427_vm0, %v513_v47  ;;  %775 = vst.msk [vmem:[%s1000_s20 + $0x128] sm:$0xff] %vm427_vm0, %v481_v48 }
 0x168   : > { %v514_v49 = vpop.trf.xlu1  ;;  %v482_v50 = vpop.trf.xlu0 }
 0x169   : > { %792 = vst.msk [vmem:[%s1000_s20 + $0x1b0] sm:$0xff] %vm427_vm0, %v514_v49  ;;  %776 = vst.msk [vmem:[%s1000_s20 + $0x130] sm:$0xff] %vm427_vm0, %v482_v50 }
 0x16c   : > { %v515_v51 = vpop.trf.xlu1  ;;  %v483_v52 = vpop.trf.xlu0 }
 0x16d   : > { %793 = vst.msk [vmem:[%s1000_s20 + $0x1b8] sm:$0xff] %vm427_vm0, %v515_v51  ;;  %777 = vst.msk [vmem:[%s1000_s20 + $0x138] sm:$0xff] %vm427_vm0, %v483_v52 }
 0x170   : > { %v516_v53 = vpop.trf.xlu1  ;;  %v484_v54 = vpop.trf.xlu0 }
 0x171   : > { %794 = vst.msk [vmem:[%s1000_s20 + $0x1c0] sm:$0xff] %vm427_vm0, %v516_v53  ;;  %778 = vst.msk [vmem:[%s1000_s20 + $0x140] sm:$0xff] %vm427_vm0, %v484_v54 }
 0x174   : > { %v517_v55 = vpop.trf.xlu1  ;;  %v485_v56 = vpop.trf.xlu0 }
 0x175   : > { %795 = vst.msk [vmem:[%s1000_s20 + $0x1c8] sm:$0xff] %vm427_vm0, %v517_v55  ;;  %779 = vst.msk [vmem:[%s1000_s20 + $0x148] sm:$0xff] %vm427_vm0, %v485_v56 }
 0x178   : > { %v518_v57 = vpop.trf.xlu1  ;;  %v486_v58 = vpop.trf.xlu0 }
 0x179   : > { %796 = vst.msk [vmem:[%s1000_s20 + $0x1d0] sm:$0xff] %vm427_vm0, %v518_v57  ;;  %780 = vst.msk [vmem:[%s1000_s20 + $0x150] sm:$0xff] %vm427_vm0, %v486_v58 }
 0x17c   : > { %v519_v59 = vpop.trf.xlu1  ;;  %v487_v60 = vpop.trf.xlu0 }
 0x17d   : > { %797 = vst.msk [vmem:[%s1000_s20 + $0x1d8] sm:$0xff] %vm427_vm0, %v519_v59  ;;  %781 = vst.msk [vmem:[%s1000_s20 + $0x158] sm:$0xff] %vm427_vm0, %v487_v60 }
 0x180   : > { %v520_v61 = vpop.trf.xlu1  ;;  %v488_v62 = vpop.trf.xlu0 }
 0x181   : > { %798 = vst.msk [vmem:[%s1000_s20 + $0x1e0] sm:$0xff] %vm427_vm0, %v520_v61  ;;  %782 = vst.msk [vmem:[%s1000_s20 + $0x160] sm:$0xff] %vm427_vm0, %v488_v62 }
 0x184   : > { %v521_v63 = vpop.trf.xlu1  ;;  %v489_v0 = vpop.trf.xlu0 }
 0x185   : > { %799 = vst.msk [vmem:[%s1000_s20 + $0x1e8] sm:$0xff] %vm427_vm0, %v521_v63  ;;  %783 = vst.msk [vmem:[%s1000_s20 + $0x168] sm:$0xff] %vm427_vm0, %v489_v0 }
 0x188   : > { %v522_v1 = vpop.trf.xlu1  ;;  %v490_v2 = vpop.trf.xlu0 }
 0x189   : > { %800 = vst.msk [vmem:[%s1000_s20 + $0x1f0] sm:$0xff] %vm427_vm0, %v522_v1  ;;  %784 = vst.msk [vmem:[%s1000_s20 + $0x170] sm:$0xff] %vm427_vm0, %v490_v2 }
 0x18c   : > { %v523_v3 = vpop.trf.xlu1  ;;  %v491_v4 = vpop.trf.xlu0 }
 0x18d   : > { %801 = vst.msk [vmem:[%s1000_s20 + $0x1f8] sm:$0xff] %vm427_vm0, %v523_v3  ;;  %785 = vst.msk [vmem:[%s1000_s20 + $0x178] sm:$0xff] %vm427_vm0, %v491_v4 }
 0x190   : > { %v605_v5 = vpop.trf.xlu1  ;;  %v573_v6 = vpop.trf.xlu0 }
 0x191   : > { %818 = vst.msk [vmem:[%s1000_s20 + $0x280] sm:$0xff] %vm427_vm0, %v605_v5  ;;  %802 = vst.msk [vmem:[%s1000_s20 + $0x200] sm:$0xff] %vm427_vm0, %v573_v6 }
 0x194   : > { %v606_v7 = vpop.trf.xlu1  ;;  %v574_v8 = vpop.trf.xlu0 }
 0x195   : > { %819 = vst.msk [vmem:[%s1000_s20 + $0x288] sm:$0xff] %vm427_vm0, %v606_v7  ;;  %803 = vst.msk [vmem:[%s1000_s20 + $0x208] sm:$0xff] %vm427_vm0, %v574_v8 }
 0x198   : > { %v607_v9 = vpop.trf.xlu1  ;;  %v575_v10 = vpop.trf.xlu0 }
 0x199   : > { %820 = vst.msk [vmem:[%s1000_s20 + $0x290] sm:$0xff] %vm427_vm0, %v607_v9  ;;  %804 = vst.msk [vmem:[%s1000_s20 + $0x210] sm:$0xff] %vm427_vm0, %v575_v10 }
 0x19c   : > { %v608_v11 = vpop.trf.xlu1  ;;  %v576_v12 = vpop.trf.xlu0 }
 0x19d   : > { %821 = vst.msk [vmem:[%s1000_s20 + $0x298] sm:$0xff] %vm427_vm0, %v608_v11  ;;  %805 = vst.msk [vmem:[%s1000_s20 + $0x218] sm:$0xff] %vm427_vm0, %v576_v12 }
 0x1a0   : > { %v609_v13 = vpop.trf.xlu1  ;;  %v577_v14 = vpop.trf.xlu0 }
 0x1a1   : > { %822 = vst.msk [vmem:[%s1000_s20 + $0x2a0] sm:$0xff] %vm427_vm0, %v609_v13  ;;  %806 = vst.msk [vmem:[%s1000_s20 + $0x220] sm:$0xff] %vm427_vm0, %v577_v14 }
 0x1a4   : > { %v610_v15 = vpop.trf.xlu1  ;;  %v578_v16 = vpop.trf.xlu0 }
 0x1a5   : > { %823 = vst.msk [vmem:[%s1000_s20 + $0x2a8] sm:$0xff] %vm427_vm0, %v610_v15  ;;  %807 = vst.msk [vmem:[%s1000_s20 + $0x228] sm:$0xff] %vm427_vm0, %v578_v16 }
 0x1a8   : > { %v611_v17 = vpop.trf.xlu1  ;;  %v579_v18 = vpop.trf.xlu0 }
 0x1a9   : > { %824 = vst.msk [vmem:[%s1000_s20 + $0x2b0] sm:$0xff] %vm427_vm0, %v611_v17  ;;  %808 = vst.msk [vmem:[%s1000_s20 + $0x230] sm:$0xff] %vm427_vm0, %v579_v18 }
 0x1ac   : > { %v612_v19 = vpop.trf.xlu1  ;;  %v580_v20 = vpop.trf.xlu0 }
 0x1ad   : > { %825 = vst.msk [vmem:[%s1000_s20 + $0x2b8] sm:$0xff] %vm427_vm0, %v612_v19  ;;  %809 = vst.msk [vmem:[%s1000_s20 + $0x238] sm:$0xff] %vm427_vm0, %v580_v20 }
 0x1b0   : > { %v613_v21 = vpop.trf.xlu1  ;;  %v581_v22 = vpop.trf.xlu0 }
 0x1b1   : > { %826 = vst.msk [vmem:[%s1000_s20 + $0x2c0] sm:$0xff] %vm427_vm0, %v613_v21  ;;  %810 = vst.msk [vmem:[%s1000_s20 + $0x240] sm:$0xff] %vm427_vm0, %v581_v22 }
 0x1b4   : > { %v614_v23 = vpop.trf.xlu1  ;;  %v582_v24 = vpop.trf.xlu0 }
 0x1b5   : > { %827 = vst.msk [vmem:[%s1000_s20 + $0x2c8] sm:$0xff] %vm427_vm0, %v614_v23  ;;  %811 = vst.msk [vmem:[%s1000_s20 + $0x248] sm:$0xff] %vm427_vm0, %v582_v24 }
 0x1b8   : > { %v615_v25 = vpop.trf.xlu1  ;;  %v583_v26 = vpop.trf.xlu0 }
 0x1b9   : > { %828 = vst.msk [vmem:[%s1000_s20 + $0x2d0] sm:$0xff] %vm427_vm0, %v615_v25  ;;  %812 = vst.msk [vmem:[%s1000_s20 + $0x250] sm:$0xff] %vm427_vm0, %v583_v26 }
 0x1bc   : > { %v616_v27 = vpop.trf.xlu1  ;;  %v584_v28 = vpop.trf.xlu0 }
 0x1bd   : > { %829 = vst.msk [vmem:[%s1000_s20 + $0x2d8] sm:$0xff] %vm427_vm0, %v616_v27  ;;  %813 = vst.msk [vmem:[%s1000_s20 + $0x258] sm:$0xff] %vm427_vm0, %v584_v28 }
 0x1c0   : > { %v617_v29 = vpop.trf.xlu1  ;;  %v585_v30 = vpop.trf.xlu0 }
 0x1c1   : > { %830 = vst.msk [vmem:[%s1000_s20 + $0x2e0] sm:$0xff] %vm427_vm0, %v617_v29  ;;  %814 = vst.msk [vmem:[%s1000_s20 + $0x260] sm:$0xff] %vm427_vm0, %v585_v30 }
 0x1c4   : > { %v618_v31 = vpop.trf.xlu1  ;;  %v586_v32 = vpop.trf.xlu0 }
 0x1c5   : > { %831 = vst.msk [vmem:[%s1000_s20 + $0x2e8] sm:$0xff] %vm427_vm0, %v618_v31  ;;  %815 = vst.msk [vmem:[%s1000_s20 + $0x268] sm:$0xff] %vm427_vm0, %v586_v32 }
 0x1c8   : > { %v619_v33 = vpop.trf.xlu1  ;;  %v587_v34 = vpop.trf.xlu0 }
 0x1c9   : > { %832 = vst.msk [vmem:[%s1000_s20 + $0x2f0] sm:$0xff] %vm427_vm0, %v619_v33  ;;  %816 = vst.msk [vmem:[%s1000_s20 + $0x270] sm:$0xff] %vm427_vm0, %v587_v34 }
 0x1cc   : > { %v620_v35 = vpop.trf.xlu1  ;;  %v588_v36 = vpop.trf.xlu0 }
 0x1cd   : > { %833 = vst.msk [vmem:[%s1000_s20 + $0x2f8] sm:$0xff] %vm427_vm0, %v620_v35  ;;  %817 = vst.msk [vmem:[%s1000_s20 + $0x278] sm:$0xff] %vm427_vm0, %v588_v36 }
 0x1ce PF: > { %s14_s17 = sadd.s32 1, %s912_s17   ;;  %s1208_s15 = smov %s908_s16 }
 0x1cf   : > { %p11_p5 = scmp.ge.s32.totalorder %s14_s17, 4   ;;  %s1209_s16 = smov %s1211_s18 }
 0x1d1   :  { %13 = sbr.rel (!%p11_p5) target bundleno = 2 (0x2), region = 71 }

// kernel: tpu_custom_call.1
= control target key start
LH: loop header
LB: loop body
LE: loop exit
PB: predicated region body
PF: predicated region fallthrough
CT: control target
= control target key end

     0   :  { %s589_s15 = smov 0   ;;  %s591_s16 = smov 0   ;;  %s653_s0 = inlined_call_operand.vmem [shape: f32[3,7,1], index: 0, kind: input, shape index: {}]   ;;  %s654_s1 = inlined_call_operand.vmem [shape: f32[3,7,1], index: 1, kind: input, shape index: {}]   ;;  %s655_s2 = inlined_call_operand.vmem [shape: f32[7,256], index: 2, kind: input, shape index: {}]   ;;  %s656_s3 = inlined_call_operand.vmem [shape: f32[2,3,7,256], index: 3, kind: input, shape index: {}]   ;;  %s657_s4 = inlined_call_operand.vmem [shape: f32[2,3,7,256], index: 4, kind: output, shape index: {}]  }
   0x1   :  { %s593_s17 = smov 0  }
   0x2 LB: > { %s23_s18 = sadd.s32 1, %s557_s16  ;;  %p476_p0 = scmp.ge.s32.totalorder %s561_s17, 1  ;;  %s561_s17 = sphi %s593_s17, %s14_s17   ;;  %s557_s16 = sphi %s591_s16, %s659_s16   ;;  %s553_s15 = sphi %s589_s15, %s658_s15  }
   0x3   : > { %p24_p1 = scmp.ge.s32.totalorder %s23_s18, 2  ;;  %p194_p2 = scmp.lt.s32.totalorder %s561_s17, 3 }
   0x5   : > { %s661_s18 = smov (%p24_p1, %s23_s18), 0  ;;  %p195_p3 = pnand %p476_p0, %p194_p2 }
   0x6   : > { %p240_p4 = scmp.lt.s32.totalorder (!%p195_p3), %s553_s15, 1 }
   0x7   : > { %198 = sbr.rel (%p195_p3) target bundleno = 154 (0x9a), region = 36 }
   0xc   : > { %v303_v0 = vld [vmem:[%s653_s0 + $0x10] sm:$0x7f]  ;;  %v301_v1 = vld [vmem:[%s653_s0] sm:$0x7f]  ;;  %v563_v2 = vmov 0   ;;  %s663_s15 = smov (!%p240_p4, %s553_s15), 1 }
   0xd   : > { %514 = vset.pattern.permute.xlu1 %v563_v2  ;;  %513 = vset.pattern.permute.xlu0 %v563_v2  ;;  %v325_v3 = vld [vmem:[%s654_s1] sm:$0x7f]  ;;  %v302_v4 = vld [vmem:[%s653_s0 + $0x8] sm:$0x7f]  ;;  %v327_v5 = vld [vmem:[%s654_s1 + $0x10] sm:$0x7f] }
   0xe   : > { %316 = vperm.xlu1 %514, %v303_v0   ;;  %306 = vperm.xlu0 %513, %v301_v1   ;;  %v326_v6 = vld [vmem:[%s654_s1 + $0x8] sm:$0x7f]  ;;  %s487_s5 = smul.u32 48, %s663_s15  ;;  %v355_v45 = vld [vmem:[%s655_s2] sm:$0x7f] }
   0xf   : > { %v356_v46 = vld [vmem:[%s655_s2 + $0x8] sm:$0x7f] }
  0x10   : > { %s247_s8 = scalar_lea.vmem %s656_s3, %s487_s5  ;;  %s257_s19 = scalar_lea.vmem %s657_s4, %s487_s5 }
  0x11   : > { %v259_v7 = vld [vmem:[%s247_s8] sm:$0x7f]  ;;  %v260_v8 = vld [vmem:[%s247_s8 + $0x8] sm:$0x7f]  ;;  %v261_v13 = vld [vmem:[%s247_s8 + $0x10] sm:$0x7f] }
  0x12   : > { %330 = vperm.xlu1 %514, %v325_v3   ;;  %311 = vperm.xlu0 %513, %v302_v4   ;;  %v263_v9 = vld [vmem:[%s247_s8 + $0x20] sm:$0x7f]  ;;  %v479_v10 = vmul.f32 -1.442695, %v259_v7  ;;  %v264_v11 = vld [vmem:[%s247_s8 + $0x28] sm:$0x7f] }
  0x13   : > { %v480_v12 = vmul.f32 -1.442695, %v260_v8  ;;  %v483_v14 = vmul.f32 -1.442695, %v263_v9  ;;  %v262_v15 = vld [vmem:[%s247_s8 + $0x18] sm:$0x7f] }
  0x14   : > { %v484_v16 = vmul.f32 -1.442695, %v264_v11  ;;  %515 = vpow2.f32 %v479_v10  ;;  %v481_v17 = vmul.f32 -1.442695, %v261_v13  ;;  %v482_v18 = vmul.f32 -1.442695, %v262_v15 }
  0x15   : > { %517 = vpow2.f32 %v480_v12 }
  0x16   : > { %340 = vperm.xlu1 %514, %v327_v5   ;;  %335 = vperm.xlu0 %513, %v326_v6   ;;  %519 = vpow2.f32 %v483_v14 }
  0x17   : > { %521 = vpow2.f32 %v484_v16 }
  0x18   : > { %523 = vpow2.f32 %v481_v17 }
  0x19   : > { %525 = vpow2.f32 %v482_v18 }
  0x21   : > { %v516_v19 = vpop.eup %515 }
  0x22   : > { %v518_v20 = vpop.eup %517  ;;  %v283_v22 = vadd.f32 1.0, %v516_v19 }
  0x23   : > { %v520_v21 = vpop.eup %519  ;;  %v284_v24 = vadd.f32 1.0, %v518_v20 }
  0x24   : > { %v522_v23 = vpop.eup %521  ;;  %v287_v27 = vadd.f32 1.0, %v520_v21  ;;  %527 = vrcp.f32 %v283_v22 }
  0x25   : > { %v524_v25 = vpop.eup %523  ;;  %v288_v28 = vadd.f32 1.0, %v522_v23  ;;  %529 = vrcp.f32 %v284_v24 }
  0x26   : > { %v526_v26 = vpop.eup %525  ;;  %v285_v29 = vadd.f32 1.0, %v524_v25  ;;  %531 = vrcp.f32 %v287_v27 }
  0x27   : > { %v286_v30 = vadd.f32 1.0, %v526_v26  ;;  %533 = vrcp.f32 %v288_v28 }
  0x28   : > { %535 = vrcp.f32 %v285_v29 }
  0x29   : > { %537 = vrcp.f32 %v286_v30 }
  0x31   : > { %v528_v31 = vpop.eup %527 }
  0x32   : > { %v530_v32 = vpop.eup %529 }
  0x33   : > { %v532_v35 = vpop.eup %531 }
  0x34   : > { %v534_v36 = vpop.eup %533 }
  0x35   : > { %v536_v39 = vpop.eup %535 }
  0x36   : > { %v538_v42 = vpop.eup %537 }
  0x89   : > { %v317_v33 = vpop.permute.xlu1 %316  ;;  %v307_v34 = vpop.permute.xlu0 %306 }
  0x8a   : > { %v319_v37 = vmul.f32 %v528_v31, %v307_v34  ;;  %v320_v38 = vmul.f32 %v530_v32, %v307_v34  ;;  %v323_v47 = vmul.f32 %v532_v35, %v317_v33  ;;  %v324_v48 = vmul.f32 %v534_v36, %v317_v33 }
  0x8d   : > { %v331_v40 = vpop.permute.xlu1 %330  ;;  %v312_v41 = vpop.permute.xlu0 %311 }
  0x8e   : > { %v343_v43 = vadd.f32 %v331_v40, %v319_v37  ;;  %v344_v44 = vadd.f32 %v331_v40, %v320_v38  ;;  %v321_v51 = vmul.f32 %v536_v39, %v312_v41  ;;  %v322_v52 = vmul.f32 %v538_v42, %v312_v41 }
  0x90   : > { %v349_v49 = vmul.f32 %v528_v31, %v343_v43  ;;  %v350_v50 = vmul.f32 %v530_v32, %v344_v44 }
  0x91   : > { %v341_v53 = vpop.permute.xlu1 %340  ;;  %v336_v54 = vpop.permute.xlu0 %335 }
  0x92   : > { %v357_v55 = vadd.f32 %v355_v45, %v349_v49  ;;  %v358_v56 = vadd.f32 %v356_v46, %v350_v50  ;;  %v347_v57 = vadd.f32 %v341_v53, %v323_v47  ;;  %v348_v58 = vadd.f32 %v341_v53, %v324_v48 }
  0x93   : > { %v345_v59 = vadd.f32 %v336_v54, %v321_v51  ;;  %v346_v60 = vadd.f32 %v336_v54, %v322_v52 }
  0x94   : > { %363 = vst [vmem:[%s257_s19] sm:$0x7f] %v357_v55  ;;  %364 = vst [vmem:[%s257_s19 + $0x8] sm:$0x7f] %v358_v56  ;;  %v353_v61 = vmul.f32 %v532_v35, %v347_v57  ;;  %v354_v62 = vmul.f32 %v534_v36, %v348_v58 }
  0x95   : > { %v351_v63 = vmul.f32 %v536_v39, %v345_v59  ;;  %v352_v0 = vmul.f32 %v538_v42, %v346_v60 }
  0x96   : > { %v361_v1 = vadd.f32 %v355_v45, %v353_v61  ;;  %v362_v2 = vadd.f32 %v356_v46, %v354_v62 }
  0x97   : > { %v359_v3 = vadd.f32 %v355_v45, %v351_v63  ;;  %v360_v4 = vadd.f32 %v356_v46, %v352_v0 }
  0x98   : > { %367 = vst [vmem:[%s257_s19 + $0x20] sm:$0x7f] %v361_v1  ;;  %368 = vst [vmem:[%s257_s19 + $0x28] sm:$0x7f] %v362_v2 }
  0x99   : > { %365 = vst [vmem:[%s257_s19 + $0x10] sm:$0x7f] %v359_v3  ;;  %366 = vst [vmem:[%s257_s19 + $0x18] sm:$0x7f] %v360_v4 }
  0x9a PF: > { %s14_s17 = sadd.s32 1, %s561_s17   ;;  %s658_s15 = smov %s557_s16 }
  0x9b   : > { %p11_p5 = scmp.ge.s32.totalorder %s14_s17, 4   ;;  %s659_s16 = smov %s661_s18 }
  0x9d   :  { %13 = sbr.rel (!%p11_p5) target bundleno = 2 (0x2), region = 69 }

</bundles_post_ra>
